<compile_context>
chip_gen: v5e
topology: v5e:2x2
jax: 0.10.0
libtpu: 0.0.40
codegen_flags: <defaults>
</compile_context>

<pallas_src>
import functools

import jax
import jax.numpy as jnp
from jax.experimental import pallas as pl
from jax.experimental.pallas import tpu as pltpu

D_IN = 784      # 1*28*28
H_PAD = 128     # hidden 50 -> 128 (lane-dense)
N_PAD = 128     # output 10 -> 128 (lane-dense, unmasked stores)
NEG = -1e30     # bias for padded output columns: exp underflows to exactly 0


def net_kernel(x_ref, w1_ref, b1_ref, w2_ref, b2_ref, o_ref):
    # Cast x to bf16 in-kernel (VPU) — avoids a dedicated HBM convert pass.
    x = x_ref[...].astype(jnp.bfloat16)
    # Linear(784,50) + ReLU: bf16 operands, f32 MXU accumulate.
    h = jnp.dot(x, w1_ref[...], preferred_element_type=jnp.float32)
    h = jnp.maximum(h + b1_ref[...], jnp.float32(0.0))
    # Dropout -> identity (eval mode).
    # Linear(50,10) padded to (128,128), bf16 GEMM; padded out-cols carry -1e30 bias.
    y = jnp.dot(h.astype(jnp.bfloat16), w2_ref[...],
                preferred_element_type=jnp.float32) + b2_ref[...]
    # log_softmax(dim=1).  The module applies it twice, but log_softmax of
    # log-probabilities is the identity, so one application suffices.
    m = jnp.max(y, axis=-1, keepdims=True)
    lse = jnp.log(jnp.sum(jnp.exp(y - m), axis=-1, keepdims=True))
    o_ref[...] = (y - m - lse).astype(o_ref.dtype)


def _pad_params(w1, b1, w2, b2):
    h = w1.shape[1]   # 50
    n = w2.shape[1]   # 10
    w1p = jnp.zeros((D_IN, H_PAD), jnp.float32).at[:, :h].set(w1).astype(jnp.bfloat16)
    b1p = jnp.zeros((1, H_PAD), jnp.float32).at[:, :h].set(b1.reshape(1, h))
    w2p = jnp.zeros((H_PAD, N_PAD), jnp.float32).at[:h, :n].set(w2).astype(jnp.bfloat16)
    b2p = jnp.full((1, N_PAD), NEG, jnp.float32).at[:, :n].set(b2.reshape(1, n))
    return w1p, b1p, w2p, b2p


@functools.partial(jax.jit, static_argnames=("block_b",))
def net_forward(x_nchw, w1, b1, w2, b2, *, block_b=1024):
    B = x_nchw.shape[0]
    n_out = w2.shape[1]
    # Row-major flatten == torch flatten; stays f32 (metadata-only reshape,
    # no extra HBM pass — the bf16 cast happens inside the kernel).
    x = x_nchw.reshape(B, D_IN)

    # Batch tile: multiple of 8 (f32 sublane packing), capped at block_b.
    tb = min(block_b, ((B + 7) // 8) * 8)
    # Keep >=2 tiles for reasonably sized batches so the "parallel" batch axis
    # can be sharded across v7x's two TensorCores.
    if B >= 16 and (B + tb - 1) // tb < 2:
        tb = (((B + 1) // 2) + 7) // 8 * 8
    grid_b = pl.cdiv(B, tb)

    w1p, b1p, w2p, b2p = _pad_params(w1, b1, w2, b2)

    cost = pl.CostEstimate(
        flops=2 * B * (D_IN * H_PAD + H_PAD * N_PAD),
        transcendentals=B * (N_PAD + 1),
        bytes_accessed=(B * D_IN * 4                   # x (f32 in HBM)
                        + D_IN * H_PAD * 2             # w1 (bf16)
                        + H_PAD * N_PAD * 2            # w2 (bf16)
                        + (H_PAD + N_PAD) * 4          # biases
                        + B * N_PAD * 4),              # output
    )

    out = pl.pallas_call(
        net_kernel,
        out_shape=jax.ShapeDtypeStruct((B, N_PAD), jnp.float32),
        grid=(grid_b,),
        in_specs=[
            pl.BlockSpec((tb, D_IN), lambda i: (i, 0)),       # x tile (ragged last ok)
            pl.BlockSpec((D_IN, H_PAD), lambda i: (0, 0)),    # w1 (resident)
            pl.BlockSpec((1, H_PAD), lambda i: (0, 0)),       # b1 (resident)
            pl.BlockSpec((H_PAD, N_PAD), lambda i: (0, 0)),   # w2 (resident)
            pl.BlockSpec((1, N_PAD), lambda i: (0, 0)),       # b2 (resident)
        ],
        out_specs=pl.BlockSpec((tb, N_PAD), lambda i: (i, 0)),
        compiler_params=pltpu.CompilerParams(
            dimension_semantics=("parallel",),
            vmem_limit_bytes=48 * 1024 * 1024),
        cost_estimate=cost,
    )(x, w1p, b1p, w2p, b2p)

    # Column slice only (128 -> 10); ideally fused into the consumer downstream.
    return out[:, :n_out]


def init_params(key):
    # Deterministic init mimicking nn.Linear's uniform(-1/sqrt(fan_in), +1/sqrt(fan_in))
    k1, k2, k3, k4 = jax.random.split(key, 4)
    bound1 = 1.0 / jnp.sqrt(784.0)
    bound2 = 1.0 / jnp.sqrt(50.0)
    # stored as (in, out) so the kernel does x @ W (== PyTorch x @ W^T with W [out,in])
    w1 = jax.random.uniform(k1, (784, 50), jnp.float32, -bound1, bound1)
    b1 = jax.random.uniform(k2, (1, 50), jnp.float32, -bound1, bound1)
    w2 = jax.random.uniform(k3, (50, 10), jnp.float32, -bound2, bound2)
    b2 = jax.random.uniform(k4, (1, 10), jnp.float32, -bound2, bound2)
    return w1, b1, w2, b2


def reference_forward(x_nchw, w1, b1, w2, b2):
    # Same math as the PyTorch module (eval mode); mirrors the kernel's bf16 GEMM path.
    x = x_nchw.reshape(x_nchw.shape[0], -1).astype(jnp.bfloat16)
    h = jnp.dot(x, w1.astype(jnp.bfloat16), preferred_element_type=jnp.float32) + b1
    h = jnp.maximum(h, 0.0)
    y = jnp.dot(h.astype(jnp.bfloat16), w2.astype(jnp.bfloat16),
                preferred_element_type=jnp.float32) + b2
    y = jax.nn.log_softmax(y, axis=1)
    return jax.nn.log_softmax(y, axis=1)


if __name__ == "__main__":
    key = jax.random.PRNGKey(0)
    kx, kp = jax.random.split(key)
    # MNIST-shaped input: NCHW [B, 1, 28, 28] -> flattened to 784 in the wrapper
    x = jax.random.normal(kx, (2, 1, 28, 28), jnp.float32)
    w1, b1, w2, b2 = init_params(kp)

    out = net_forward(x, w1, b1, w2, b2)
    out = jax.block_until_ready(out)

    ref = reference_forward(x, w1, b1, w2, b2)
    assert out.shape == (2, 10)
    assert jnp.allclose(out, ref, atol=1e-3, rtol=1e-3), "mismatch vs. reference"

    print("KERNEL_OK")
</pallas_src>

<mosaic_0001>
module attributes {stable_mosaic.version = 11 : i64} {
  func.func @net_kernel(%arg0: i32, %arg1: memref<8x784xf32, #tpu.memory_space<vmem>>, %arg2: memref<784x128xbf16, #tpu.memory_space<vmem>>, %arg3: memref<1x128xf32, #tpu.memory_space<vmem>>, %arg4: memref<128x128xbf16, #tpu.memory_space<vmem>>, %arg5: memref<1x128xf32, #tpu.memory_space<vmem>>, %arg6: memref<8x128xf32, #tpu.memory_space<vmem>>) attributes {dimension_semantics = [#tpu.dimension_semantics<parallel>], iteration_bounds = array<i64: 1>, scalar_prefetch = 0 : i64, scratch_operands = 0 : i64, tpu.core_type = #tpu.core_type<tc>, window_params = [{transform_indices = @transform_0, window_bounds = array<i64: 8, 784>}, {pipeline_mode = #tpu.pipeline_mode<synchronous>, transform_indices = @transform_1, window_bounds = array<i64: 784, 128>}, {pipeline_mode = #tpu.pipeline_mode<synchronous>, transform_indices = @transform_2, window_bounds = array<i64: 1, 128>}, {pipeline_mode = #tpu.pipeline_mode<synchronous>, transform_indices = @transform_3, window_bounds = array<i64: 128, 128>}, {pipeline_mode = #tpu.pipeline_mode<synchronous>, transform_indices = @transform_4, window_bounds = array<i64: 1, 128>}, {transform_indices = @transform_5, window_bounds = array<i64: 8, 128>}]} {
    %c0 = arith.constant 0 : index
    %c0_0 = arith.constant 0 : index
    %0 = vector.load %arg1[%c0, %c0_0] : memref<8x784xf32, #tpu.memory_space<vmem>>, vector<8x784xf32>
    %1 = arith.truncf %0 : vector<8x784xf32> to vector<8x784xbf16>
    %c0_1 = arith.constant 0 : index
    %c0_2 = arith.constant 0 : index
    %2 = vector.load %arg2[%c0_1, %c0_2] : memref<784x128xbf16, #tpu.memory_space<vmem>>, vector<784x128xbf16>
    %cst = arith.constant dense<0.000000e+00> : vector<8x128xf32>
    %3 = tpu.matmul %1, %2, %cst {dimension_numbers = #tpu.dot_dimension_numbers<[1], [0], [0], [1], [0, 0, 1, 1], [], []>} : vector<8x784xbf16>, vector<784x128xbf16>, vector<8x128xf32> -> vector<8x128xf32>
    %c0_3 = arith.constant 0 : index
    %c0_4 = arith.constant 0 : index
    %4 = vector.load %arg3[%c0_3, %c0_4] : memref<1x128xf32, #tpu.memory_space<vmem>>, vector<1x128xf32>
    %5 = vector.broadcast %4 : vector<1x128xf32> to vector<8x128xf32>
    %6 = arith.addf %3, %5 : vector<8x128xf32>
    %cst_5 = arith.constant 0.000000e+00 : f32
    %7 = vector.broadcast %cst_5 : f32 to vector<8x128xf32>
    %8 = arith.maximumf %6, %7 : vector<8x128xf32>
    %9 = arith.truncf %8 : vector<8x128xf32> to vector<8x128xbf16>
    %c0_6 = arith.constant 0 : index
    %c0_7 = arith.constant 0 : index
    %10 = vector.load %arg4[%c0_6, %c0_7] : memref<128x128xbf16, #tpu.memory_space<vmem>>, vector<128x128xbf16>
    %cst_8 = arith.constant dense<0.000000e+00> : vector<8x128xf32>
    %11 = tpu.matmul %9, %10, %cst_8 {dimension_numbers = #tpu.dot_dimension_numbers<[1], [0], [0], [1], [0, 0, 1, 1], [], []>} : vector<8x128xbf16>, vector<128x128xbf16>, vector<8x128xf32> -> vector<8x128xf32>
    %c0_9 = arith.constant 0 : index
    %c0_10 = arith.constant 0 : index
    %12 = vector.load %arg5[%c0_9, %c0_10] : memref<1x128xf32, #tpu.memory_space<vmem>>, vector<1x128xf32>
    %13 = vector.broadcast %12 : vector<1x128xf32> to vector<8x128xf32>
    %14 = arith.addf %11, %13 : vector<8x128xf32>
    %cst_11 = arith.constant dense<0xFF800000> : vector<8xf32>
    %15 = vector.multi_reduction <maximumf>, %14, %cst_11 [1] : vector<8x128xf32> to vector<8xf32>
    %16 = vector.shape_cast %15 : vector<8xf32> to vector<8x1xf32>
    %17 = vector.broadcast %16 : vector<8x1xf32> to vector<8x128xf32>
    %18 = arith.subf %14, %17 : vector<8x128xf32>
    %19 = math.exp %18 : vector<8x128xf32>
    %cst_12 = arith.constant dense<0.000000e+00> : vector<8xf32>
    %20 = vector.multi_reduction <add>, %19, %cst_12 [1] : vector<8x128xf32> to vector<8xf32>
    %21 = vector.shape_cast %20 : vector<8xf32> to vector<8x1xf32>
    %22 = math.log %21 : vector<8x1xf32>
    %23 = vector.broadcast %16 : vector<8x1xf32> to vector<8x128xf32>
    %24 = arith.subf %14, %23 : vector<8x128xf32>
    %25 = vector.broadcast %22 : vector<8x1xf32> to vector<8x128xf32>
    %26 = arith.subf %24, %25 : vector<8x128xf32>
    %c0_13 = arith.constant 0 : index
    %c0_14 = arith.constant 0 : index
    %27 = vector.load %arg6[%c0_13, %c0_14] : memref<8x128xf32, #tpu.memory_space<vmem>>, vector<8x128xf32>
    tpu.vector_store %arg6[%c0_13, %c0_14], %26 {strides = array<i32>} : memref<8x128xf32, #tpu.memory_space<vmem>>, vector<8x128xf32>,
    return
  }
  func.func @transform_0(%arg0: i32) -> (i32, i32) {
    %c0_i32 = arith.constant 0 : i32
    %c0_i32_0 = arith.constant 0 : i32
    return %arg0, %c0_i32 : i32, i32
  }
  func.func @transform_1(%arg0: i32) -> (i32, i32) {
    %c0_i32 = arith.constant 0 : i32
    %c0_i32_0 = arith.constant 0 : i32
    %c0_i32_1 = arith.constant 0 : i32
    return %c0_i32, %c0_i32_0 : i32, i32
  }
  func.func @transform_2(%arg0: i32) -> (i32, i32) {
    %c0_i32 = arith.constant 0 : i32
    %c0_i32_0 = arith.constant 0 : i32
    %c0_i32_1 = arith.constant 0 : i32
    return %c0_i32, %c0_i32_0 : i32, i32
  }
  func.func @transform_3(%arg0: i32) -> (i32, i32) {
    %c0_i32 = arith.constant 0 : i32
    %c0_i32_0 = arith.constant 0 : i32
    %c0_i32_1 = arith.constant 0 : i32
    return %c0_i32, %c0_i32_0 : i32, i32
  }
  func.func @transform_4(%arg0: i32) -> (i32, i32) {
    %c0_i32 = arith.constant 0 : i32
    %c0_i32_0 = arith.constant 0 : i32
    %c0_i32_1 = arith.constant 0 : i32
    return %c0_i32, %c0_i32_0 : i32, i32
  }
  func.func @transform_5(%arg0: i32) -> (i32, i32) {
    %c0_i32 = arith.constant 0 : i32
    %c0_i32_0 = arith.constant 0 : i32
    return %arg0, %c0_i32 : i32, i32
  }
}

</mosaic_0001>

<bundles_post_ra>
// kernel: net_forward.1
= control target key start
LH: loop header
LB: loop body
LE: loop exit
PB: predicated region body
PF: predicated region fallthrough
CT: control target
= control target key end

     0   :  { %10 = vsyncpa [#allocation3], 0  ;;  %vm470_vm0 = vcmask 130048   ;;  %s1235_s0 = inlined_call_operand.vmem [shape: f32[2,784], index: 0, kind: input, shape index: {}]   ;;  %s1236_s1 = inlined_call_operand.vmem [shape: bf16[784,128], index: 1, kind: input, shape index: {}]   ;;  %s1237_s2 = inlined_call_operand.vmem [shape: f32[1,128], index: 2, kind: input, shape index: {}]   ;;  %s1238_s3 = inlined_call_operand.vmem [shape: bf16[128,128], index: 3, kind: input, shape index: {}]   ;;  %s1239_s4 = inlined_call_operand.vmem [shape: f32[1,128], index: 4, kind: input, shape index: {}]   ;;  %s1240_s5 = inlined_call_operand.hbm [shape: f32[2,128], index: 5, kind: output, shape index: {}]  }
   0x1   :  { %v913_v0 = vld [vmem:[%s1236_s1 + $0x38] sm:$0xff]  ;;  %v912_v3 = vld [vmem:[%s1236_s1 + $0x30] sm:$0xff]  ;;  %v911_v7 = vld [vmem:[%s1236_s1 + $0x28] sm:$0xff] }
   0x2   :  { %v921_v1 = vld [vmem:[%s1236_s1 + $0x78] sm:$0xff]  ;;  %474 = vmatpush.bf16.msra.mxu0 %v913_v0  ;;  %v920_v4 = vld [vmem:[%s1236_s1 + $0x70] sm:$0xff]  ;;  %v919_v8 = vld [vmem:[%s1236_s1 + $0x68] sm:$0xff] }
   0x3   :  { %v929_v2 = vld [vmem:[%s1236_s1 + $0xb8] sm:$0xff]  ;;  %487 = vmatpush.bf16.msra.mxu1 %v921_v1  ;;  %v928_v5 = vld [vmem:[%s1236_s1 + $0xb0] sm:$0xff]  ;;  %v927_v9 = vld [vmem:[%s1236_s1 + $0xa8] sm:$0xff] }
   0x4   :  { %500 = vmatpush.bf16.msra.mxu2 %v929_v2  ;;  %v937_v6 = vld [vmem:[%s1236_s1 + $0xf8] sm:$0xff]  ;;  %v936_v10 = vld [vmem:[%s1236_s1 + $0xf0] sm:$0xff]  ;;  %v910_v11 = vld [vmem:[%s1236_s1 + $0x20] sm:$0xff] }
   0x5   :  { %513 = vmatpush.bf16.msra.mxu3 %v937_v6  ;;  %v918_v12 = vld [vmem:[%s1236_s1 + $0x60] sm:$0xff]  ;;  %v935_v14 = vld [vmem:[%s1236_s1 + $0xe8] sm:$0xff]  ;;  %v909_v19 = vld [vmem:[%s1236_s1 + $0x18] sm:$0xff] }
   0x6   :  { %475 = vmatpush.bf16.msra.mxu0 %v912_v3  ;;  %v926_v13 = vld [vmem:[%s1236_s1 + $0xa0] sm:$0xff]  ;;  %v24_v16 = vld [vmem:[%s1235_s0 + $0xe] sm:$0xff]  ;;  %v917_v20 = vld [vmem:[%s1236_s1 + $0x58] sm:$0xff] }
   0x7   :  { %488 = vmatpush.bf16.msra.mxu1 %v920_v4  ;;  %v22_v15 = vld [vmem:[%s1235_s0] sm:$0xff]  ;;  %v28_v18 = vld [vmem:[%s1235_s0 + $0x2a] sm:$0xff]  ;;  %40 = vst [vmem:[#allocation1 + $0x1] ss:$4 sm:$0xff] %v24_v16  ;;  %v925_v21 = vld [vmem:[%s1236_s1 + $0x98] sm:$0xff] }
   0x8   :  { %501 = vmatpush.bf16.msra.mxu2 %v928_v5  ;;  %v26_v17 = vld [vmem:[%s1235_s0 + $0x1c] sm:$0xff]  ;;  %38 = vst [vmem:[#allocation1] ss:$4 sm:$0xff] %v22_v15  ;;  %v908_v23 = vld [vmem:[%s1236_s1 + $0x10] sm:$0xff]  ;;  %v23_v24 = vld [vmem:[%s1235_s0 + $0x8] sm:$0x3f] }
   0x9   :  { %514 = vmatpush.bf16.msra.mxu3 %v936_v10  ;;  %42 = vst [vmem:[#allocation1 + $0x2] ss:$4 sm:$0xff] %v26_v17  ;;  %v934_v22 = vld [vmem:[%s1236_s1 + $0xe0] sm:$0xff]  ;;  %v25_v25 = vld [vmem:[%s1235_s0 + $0x16] sm:$0x3f]  ;;  %v907_v31 = vld [vmem:[%s1236_s1 + $0x8] sm:$0xff] }
   0xa   :  { %476 = vmatpush.bf16.msra.mxu0 %v911_v7  ;;  %44 = vst [vmem:[#allocation1 + $0x3] ss:$4 sm:$0xff] %v28_v18  ;;  %v916_v26 = vld [vmem:[%s1236_s1 + $0x50] sm:$0xff]  ;;  %v27_v27 = vld [vmem:[%s1235_s0 + $0x24] sm:$0x3f]  ;;  %v933_v30 = vld [vmem:[%s1236_s1 + $0xd8] sm:$0xff] }
   0xb   :  { %489 = vmatpush.bf16.msra.mxu1 %v919_v8  ;;  %v29_v28 = vld [vmem:[%s1235_s0 + $0x32] sm:$0x3f]  ;;  %46 = vst [vmem:[#allocation1 + $0x20] ss:$4 sm:$0xff] %v23_v24  ;;  %v915_v32 = vld [vmem:[%s1236_s1 + $0x48] sm:$0xff]  ;;  %v906_v35 = vld [vmem:[%s1236_s1] sm:$0xff] }
   0xc   :  { %502 = vmatpush.bf16.msra.mxu2 %v927_v9  ;;  %v924_v29 = vld [vmem:[%s1236_s1 + $0x90] sm:$0xff]  ;;  %48 = vst [vmem:[#allocation1 + $0x21] ss:$4 sm:$0xff] %v25_v25  ;;  %v923_v33 = vld [vmem:[%s1236_s1 + $0x88] sm:$0xff]  ;;  %v914_v36 = vld [vmem:[%s1236_s1 + $0x40] sm:$0xff] }
   0xd   :  { %515 = vmatpush.bf16.msra.mxu3 %v935_v14  ;;  %50 = vst [vmem:[#allocation1 + $0x22] ss:$4 sm:$0xff] %v27_v27  ;;  %v932_v34 = vld [vmem:[%s1236_s1 + $0xd0] sm:$0xff]  ;;  %v945_v39 = vld [vmem:[%s1236_s1 + $0x138] sm:$0xff]  ;;  %v922_v41 = vld [vmem:[%s1236_s1 + $0x80] sm:$0xff] }
   0xe   :  { %477 = vmatpush.bf16.msra.mxu0 %v910_v11  ;;  %52 = vst [vmem:[#allocation1 + $0x23] ss:$4 sm:$0xff] %v29_v28  ;;  %v953_v40 = vld [vmem:[%s1236_s1 + $0x178] sm:$0xff]  ;;  %v931_v42 = vld [vmem:[%s1236_s1 + $0xc8] sm:$0xff]  ;;  %v954_v46 = vld [vmem:[%s1236_s1 + $0x180] sm:$0xff] }
   0xf   :  { %490 = vmatpush.bf16.msra.mxu1 %v918_v12  ;;  %v944_v47 = vld [vmem:[%s1236_s1 + $0x130] sm:$0xff]  ;;  %v930_v50 = vld [vmem:[%s1236_s1 + $0xc0] sm:$0xff]  ;;  %v943_v52 = vld [vmem:[%s1236_s1 + $0x128] sm:$0xff] }
  0x10   :  { %503 = vmatpush.bf16.msra.mxu2 %v926_v13  ;;  %v952_v48 = vld [vmem:[%s1236_s1 + $0x170] sm:$0xff]  ;;  %v951_v53 = vld [vmem:[%s1236_s1 + $0x168] sm:$0xff]  ;;  %v942_v55 = vld [vmem:[%s1236_s1 + $0x120] sm:$0xff] }
  0x11   :  { %516 = vmatpush.bf16.msra.mxu3 %v934_v22  ;;  %v53_v37 = vld.sshfl [vmem:[#allocation1] sm:$0xff pattern:$0x73625140]  ;;  %v54_v38 = vld.sshfl [vmem:[#allocation1 + $0x8] sm:$0xff pattern:$0x73625140] }
  0x12   :  { %478 = vmatpush.bf16.msra.mxu0 %v909_v19  ;;  %v55_v43 = vld.sshfl [vmem:[#allocation1 + $0x10] sm:$0xff pattern:$0x73625140]  ;;  %v67_v44 = vpack.c.bf16 %v53_v37, %v53_v37  ;;  %v68_v45 = vpack.c.bf16 %v54_v38, %v54_v38  ;;  %v56_v51 = vld.sshfl [vmem:[#allocation1 + $0x18] sm:$0xff pattern:$0x73625140] }
  0x13   :  { %491 = vmatpush.bf16.msra.mxu1 %v917_v20  ;;  %v69_v49 = vpack.c.bf16 %v55_v43, %v55_v43  ;;  %v70_v54 = vpack.c.bf16 %v56_v51, %v56_v51  ;;  %v950_v56 = vld [vmem:[%s1236_s1 + $0x160] sm:$0xff]  ;;  %v941_v57 = vld [vmem:[%s1236_s1 + $0x118] sm:$0xff]  ;;  %v940_v60 = vld [vmem:[%s1236_s1 + $0x110] sm:$0xff] }
  0x14   :  { %504 = vmatpush.bf16.msra.mxu2 %v925_v21  ;;  %v949_v58 = vld [vmem:[%s1236_s1 + $0x158] sm:$0xff]  ;;  %v948_v61 = vld [vmem:[%s1236_s1 + $0x150] sm:$0xff]  ;;  %v939_v63 = vld [vmem:[%s1236_s1 + $0x108] sm:$0xff] }
  0x15   :  { %517 = vmatpush.bf16.msra.mxu3 %v933_v30  ;;  %v59_v59 = vld.sshfl [vmem:[#allocation1 + $0x30] sm:$0xff pattern:$0x73625140]  ;;  %v947_v0 = vld [vmem:[%s1236_s1 + $0x148] sm:$0xff]  ;;  %v938_v1 = vld [vmem:[%s1236_s1 + $0x100] sm:$0xff] }
  0x16   :  { %479 = vmatpush.bf16.msra.mxu0 %v908_v23  ;;  %v73_v62 = vpack.c.bf16 %v59_v59, %v59_v59  ;;  %v946_v2 = vld [vmem:[%s1236_s1 + $0x140] sm:$0xff]  ;;  %v58_v4 = vld.sshfl [vmem:[#allocation1 + $0x28] sm:$0xff pattern:$0x73625140]  ;;  %v962_v7 = vld [vmem:[%s1238_s3 + $0x38] sm:$0xff] }
  0x17   :  { %492 = vmatpush.bf16.msra.mxu1 %v916_v26  ;;  %v57_v3 = vld.sshfl [vmem:[#allocation1 + $0x20] sm:$0xff pattern:$0x73625140]  ;;  %v72_v6 = vpack.c.bf16 %v58_v4, %v58_v4  ;;  %v961_v8 = vld [vmem:[%s1238_s3 + $0x30] sm:$0xff]  ;;  %v960_v9 = vld [vmem:[%s1238_s3 + $0x28] sm:$0xff] }
  0x18   :  { %505 = vmatpush.bf16.msra.mxu2 %v924_v29  ;;  %v71_v5 = vpack.c.bf16 %v57_v3, %v57_v3  ;;  %v959_v10 = vld [vmem:[%s1238_s3 + $0x20] sm:$0xff]  ;;  %v958_v11 = vld [vmem:[%s1238_s3 + $0x18] sm:$0xff]  ;;  %v957_v12 = vld [vmem:[%s1238_s3 + $0x10] sm:$0xff] }
  0x19   :  { %518 = vmatpush.bf16.msra.mxu3 %v932_v34  ;;  %v956_v13 = vld [vmem:[%s1238_s3 + $0x8] sm:$0xff]  ;;  %v955_v16 = vld [vmem:[%s1238_s3] sm:$0xff] }
  0x1a   :  { %480 = vmatpush.bf16.msra.mxu0 %v907_v31  ;;  %v966_v20 = vld [vmem:[%s1237_s2] ss:$0 sm:$0xff] }
  0x1b   :  { %493 = vmatpush.bf16.msra.mxu1 %v915_v32 }
  0x1c   :  { %506 = vmatpush.bf16.msra.mxu2 %v923_v33 }
  0x1d   :  { %519 = vmatpush.bf16.msra.mxu3 %v931_v42 }
  0x1e   :  { %481 = vmatpush.bf16.msra.mxu0 %v906_v35 }
  0x1f   :  { %494 = vmatpush.bf16.msra.mxu1 %v914_v36 }
  0x20   :  { %507 = vmatpush.bf16.msra.mxu2 %v922_v41 }
  0x21   :  { %482 = vmatmul.bf16.vlgmr.msra.gmra.mxu0 %v67_v44  ;;  %520 = vmatpush.bf16.msra.mxu3 %v930_v50 }
  0x22   :  { %526 = vmatpush.bf16.msrb.mxu0 %v945_v39  ;;  %495 = vmatmul.bf16.vlgmr.msra.gmra.mxu1 %v68_v45  ;;  %v967_v39 = vld [vmem:[%s1239_s4] ss:$0 sm:$0xff] }
  0x23   :  { %539 = vmatpush.bf16.msrb.mxu1 %v953_v40  ;;  %508 = vmatmul.bf16.vlgmr.msra.gmra.mxu2 %v69_v49 }
  0x24   :  { %559 = vmatpush.bf16.msrb.mxu2 %v954_v46  ;;  %521 = vmatmul.bf16.vlgmr.msra.gmra.mxu3 %v70_v54 }
  0x25   :  { %635 = vmatpush.bf16.msrb.mxu3 %v962_v7 }
  0x26   :  { %527 = vmatpush.bf16.msrb.mxu0 %v944_v47 }
  0x27   :  { %540 = vmatpush.bf16.msrb.mxu1 %v952_v48 }
  0x29   :  { %636 = vmatpush.bf16.msrb.mxu3 %v961_v8 }
  0x2a   :  { %528 = vmatpush.bf16.msrb.mxu0 %v943_v52 }
  0x2b   :  { %541 = vmatpush.bf16.msrb.mxu1 %v951_v53 }
  0x2d   :  { %637 = vmatpush.bf16.msrb.mxu3 %v960_v9 }
  0x2e   :  { %529 = vmatpush.bf16.msrb.mxu0 %v942_v55 }
  0x2f   :  { %542 = vmatpush.bf16.msrb.mxu1 %v950_v56 }
  0x31   :  { %638 = vmatpush.bf16.msrb.mxu3 %v959_v10 }
  0x32   :  { %530 = vmatpush.bf16.msrb.mxu0 %v941_v57 }
  0x33   :  { %543 = vmatpush.bf16.msrb.mxu1 %v949_v58  ;;  %873 = vmatmul.msk.bf16.vlgmr.msrb.gmra.mxu2 %vm470_vm0, %v73_v62 }
  0x35   :  { %639 = vmatpush.bf16.msrb.mxu3 %v958_v11 }
  0x36   :  { %531 = vmatpush.bf16.msrb.mxu0 %v940_v60 }
  0x37   :  { %544 = vmatpush.bf16.msrb.mxu1 %v948_v61 }
  0x39   :  { %640 = vmatpush.bf16.msrb.mxu3 %v957_v12 }
  0x3a   :  { %532 = vmatpush.bf16.msrb.mxu0 %v939_v63 }
  0x3b   :  { %545 = vmatpush.bf16.msrb.mxu1 %v947_v0 }
  0x3d   :  { %641 = vmatpush.bf16.msrb.mxu3 %v956_v13 }
  0x3e   :  { %533 = vmatpush.bf16.msrb.mxu0 %v938_v1 }
  0x3f   :  { %546 = vmatpush.bf16.msrb.mxu1 %v946_v2 }
  0x41   :  { %534 = vmatmul.bf16.vlgmr.msrb.gmra.mxu0 %v71_v5  ;;  %642 = vmatpush.bf16.msrb.mxu3 %v955_v16 }
  0x42   :  { %547 = vmatmul.bf16.vlgmr.msrb.gmra.mxu1 %v72_v6 }
  0x9e   :  { %v483_v14 = vpop.f32.mrf.mxu0 }
  0x9f   :  { %v496_v15 = vpop.f32.mrf.mxu1  ;;  %v484_v22 = vadd.f32 %v966_v20, %v483_v14 }
  0xa1   :  { %v497_v24 = vadd.f32 %v496_v15, %v484_v22 }
  0xa6   :  { %v485_v17 = vpop.f32.mrf.mxu0  ;;  %v509_v19 = vpop.f32.mrf.mxu2 }
  0xa7   :  { %v498_v18 = vpop.f32.mrf.mxu1  ;;  %v522_v21 = vpop.f32.mrf.mxu3  ;;  %v510_v26 = vadd.f32 %v509_v19, %v497_v24 }
  0xa9   :  { %v523_v28 = vadd.f32 %v522_v21, %v510_v26 }
  0xae   :  { %v511_v23 = vpop.f32.mrf.mxu2 }
  0xaf   :  { %v524_v25 = vpop.f32.mrf.mxu3 }
  0xb6   :  { %v561_v27 = vpop.f32.mrf.mxu2 }
  0xbe   :  { %v535_v29 = vpop.f32.mrf.mxu0  ;;  %v563_v33 = vpop.f32.mrf.mxu2 }
  0xbf   :  { %v548_v30 = vpop.f32.mrf.mxu1  ;;  %v536_v31 = vadd.f32 %v535_v29, %v523_v28 }
  0xc1   :  { %v549_v32 = vadd.f32 %v548_v30, %v536_v31 }
  0xc3   :  { %v562_v34 = vadd.f32 %v561_v27, %v549_v32 }
  0xc5   :  { %v565_v35 = vmax.f32 %v562_v34, 0.0 }
  0xc6   :  { %v537_v36 = vpop.f32.mrf.mxu0 }
  0xc7   :  { %v550_v37 = vpop.f32.mrf.mxu1  ;;  %v566_v38 = vpack.c.bf16 %v565_v35, %v565_v35 }
  0xc9   :  { %643 = vmatmul.bf16.vlgmr.msrb.gmra.mxu3 %v566_v38 }
 0x14c   :  { %v644_v40 = vpop.f32.mrf.mxu3 }
 0x14d   :  { %v645_v41 = vadd.f32 %v967_v39, %v644_v40 }
 0x14f   :  { %648 = vmax.xlane.f32.xlu0 %v645_v41 }
 0x154   :  { %v646_v42 = vpop.f32.mrf.mxu3 }
 0x1c2   :  { %v649_v43 = vpop.xlane.xlu0 %648 }
 0x1c3   :  { %v650_v44 = vsub.f32 %v645_v41, %v649_v43 }
 0x1c5   :  { %v651_v45 = vmul.f32 1.442695, %v650_v44 }
 0x1c7   :  { %968 = vpow2.f32 %v651_v45 }
 0x1cd   :  { %v969_v46 = vpop.eup %968 }
 0x1ce   :  { %653 = vadd.xlane.f32.xlu0 %v969_v46 }
 0x241   :  { %v654_v47 = vpop.xlane.xlu0 %653 }
 0x242   :  { %970 = vlog2.f32 %v654_v47 }
 0x248   :  { %v971_v48 = vpop.eup %970 }
 0x249   :  { %v656_v49 = vmul.f32 0.6931472, %v971_v48 }
 0x24b   :  { %v657_v50 = vsub.f32 %v650_v44, %v656_v49 }
 0x24d   :  { %658 = vst [vmem:[#allocation2] sm:$0xff] %v657_v50 }
 0x24e   :  { %662 = vsyncadd [#allocation3], 96  ;;  %s665_s4 = sshll.u32 %s1240_s5, 4  ;;  %s998_s23 = smov [#allocation2]   ;;  %s666_s4 = int_to_ptr.hbm [resolvable:$true] %s665_s4 }
 0x24f   :  { %s663_s24 = sshll.u32 %s998_s23, 4  ;;  %s999_s25 = smov 32   ;;  %s664_s24 = int_to_ptr.vmem [resolvable:$true] %s663_s24 }
 0x250   :  { %s1000_s26 = smov 2  }
 0x251   :  { %671 = dma.vmem_to_hbm [thread:$0]  %s664_s24, 32, %s666_s4, [#allocation3], %s999_s25, %s999_s25, %s1000_s26  }
 0x252   :  { %996 = dma.done.wait [#allocation3], 128  }
 0x253   :  { %997 = vsyncadd [#allocation3], 4294967168 }
 0x254   :  { %676 = vsyncpa [#allocation3], 1 }

</bundles_post_ra>
